<compile_context>
chip_gen: v6e
topology: v6e:2x2x1
jax: 0.10.0
libtpu: 0.0.40
codegen_flags: <defaults>
</compile_context>

<pallas_src>
import functools

import jax
import jax.numpy as jnp
from jax.experimental import pallas as pl
from jax.experimental.pallas import tpu as pltpu


# --------------------------------------------------------------------------- #
# Kernel: fused (policy ‖ value) MLP — 3 MXU dots, two stores (mean, value).
# --------------------------------------------------------------------------- #
def _fused_actor_critic_kernel(obs_ref, w1_ref, b1_ref, w2_ref, b2_ref,
                               w3_ref, b3_ref, mean_ref, value_ref):
    x = obs_ref[...]                                                # (TB, obs_dim) f32
    h = jnp.dot(x, w1_ref[...], preferred_element_type=jnp.float32) + b1_ref[...]
    h = jnp.maximum(h, 0.0)                                         # ReLU
    h = jnp.dot(h, w2_ref[...], preferred_element_type=jnp.float32) + b2_ref[...]
    h = jnp.maximum(h, 0.0)                                         # ReLU
    out = jnp.dot(h, w3_ref[...], preferred_element_type=jnp.float32) + b3_ref[...]
    mean_ref[...] = out[:, :3]                                      # policy head (TB, 3)
    value_ref[...] = out[:, 3:4]                                    # value head  (TB, 1)


# --------------------------------------------------------------------------- #
# Parameter construction / fusion.
# --------------------------------------------------------------------------- #
def init_params(key, obs_dim: int, hidden_size: int):
    """Deterministic per-network parameter init (scaled normals, zero biases)."""
    ks = jax.random.split(key, 6)

    def linear(k, fan_in, fan_out):
        w = jax.random.normal(k, (fan_in, fan_out), jnp.float32) / jnp.sqrt(fan_in)
        b = jnp.zeros((1, fan_out), jnp.float32)
        return w, b

    # policy net: obs_dim -> H -> H -> 3
    w1p, b1p = linear(ks[0], obs_dim, hidden_size)
    w2p, b2p = linear(ks[1], hidden_size, hidden_size)
    w3p, b3p = linear(ks[2], hidden_size, 3)
    # value net: obs_dim -> H -> H -> 1
    w1v, b1v = linear(ks[3], obs_dim, hidden_size)
    w2v, b2v = linear(ks[4], hidden_size, hidden_size)
    w3v, b3v = linear(ks[5], hidden_size, 1)

    log_std = jnp.zeros((3,), jnp.float32)  # nn.Parameter(torch.zeros(3))
    params = (w1p, b1p, w2p, b2p, w3p, b3p, w1v, b1v, w2v, b2v, w3v, b3v)
    return params, log_std


def _block_diag(a, b):
    top = jnp.concatenate([a, jnp.zeros((a.shape[0], b.shape[1]), a.dtype)], axis=1)
    bot = jnp.concatenate([jnp.zeros((b.shape[0], a.shape[1]), b.dtype), b], axis=1)
    return jnp.concatenate([top, bot], axis=0)


def fuse_params(params):
    """Fuse the two independent MLPs into one block-diagonal MLP (exact)."""
    (w1p, b1p, w2p, b2p, w3p, b3p, w1v, b1v, w2v, b2v, w3v, b3v) = params
    w1 = jnp.concatenate([w1p, w1v], axis=1)          # (obs_dim, 2H)
    b1 = jnp.concatenate([b1p, b1v], axis=1)          # (1, 2H)
    w2 = _block_diag(w2p, w2v)                        # (2H, 2H)
    b2 = jnp.concatenate([b2p, b2v], axis=1)          # (1, 2H)
    w3 = _block_diag(w3p, w3v)                        # (2H, 4)
    b3 = jnp.concatenate([b3p, b3v], axis=1)          # (1, 4)
    return (w1, b1, w2, b2, w3, b3)


# --------------------------------------------------------------------------- #
# Wrapper.
# --------------------------------------------------------------------------- #
@functools.partial(jax.jit, static_argnames=("block_rows",))
def actor_critic_forward(obs, fused_params, *, block_rows: int = 4096):
    """Returns (mean: (B, 3), value: (B,)) — same semantics as ActorCritic.forward."""
    B, obs_dim = obs.shape
    w1, b1, w2, b2, w3, b3 = fused_params
    h2 = w1.shape[1]                       # fused hidden width = 2H

    # Tile selection.  Cap at 4096 rows so double-buffered obs + the two
    # lane-padded outputs + temporaries fit the default 32 MiB scoped VMEM on
    # every generation (incl. v7x's 64 MiB physical VMEM).  Tile rows must be a
    # multiple of 8 whenever the tile is not the full batch.
    block_rows = max(8, (min(int(block_rows), 4096) // 8) * 8)

    if B <= block_rows:
        if B > 1024:
            # Force >=2 grid tiles so dimension_semantics=("parallel",) can shard
            # across both v7x TensorCores.  Ragged last block is masked by Pallas.
            tb = (((B + 1) // 2) + 7) // 8 * 8
            n_tiles = pl.cdiv(B, tb)       # == 2
        else:
            # Tiny batch: single grid step, block == full array (no (8,128) issue).
            tb = B
            n_tiles = 1
    else:
        # Large batch: stream row tiles; NO wrapper-side padding — Pallas masks the
        # ragged last block (rows are independent, so garbage rows stay masked).
        tb = block_rows
        n_tiles = pl.cdiv(B, tb)

    resident = lambda shape: pl.BlockSpec(shape, lambda i: (0, 0))  # stays in VMEM

    flops = 2 * B * (obs_dim * h2 + h2 * h2 + h2 * 4)
    weight_bytes = 4 * (obs_dim * h2 + h2 + h2 * h2 + h2 + h2 * 4 + 4)
    bytes_accessed = 4 * B * (obs_dim + 4) + weight_bytes

    mean, value = pl.pallas_call(
        _fused_actor_critic_kernel,
        out_shape=(jax.ShapeDtypeStruct((B, 3), jnp.float32),
                   jax.ShapeDtypeStruct((B, 1), jnp.float32)),
        grid_spec=pltpu.PrefetchScalarGridSpec(
            num_scalar_prefetch=0,
            grid=(n_tiles,),
            in_specs=[
                pl.BlockSpec((tb, obs_dim), lambda i: (i, 0)),  # obs tile streams
                resident(w1.shape), resident(b1.shape),         # weights resident
                resident(w2.shape), resident(b2.shape),
                resident(w3.shape), resident(b3.shape),
            ],
            out_specs=(
                pl.BlockSpec((tb, 3), lambda i: (i, 0)),
                pl.BlockSpec((tb, 1), lambda i: (i, 0)),
            ),
        ),
        compiler_params=pltpu.CompilerParams(
            dimension_semantics=("parallel",),   # megacore-shardable on v7x
        ),
        cost_estimate=pl.CostEstimate(
            flops=int(flops), transcendentals=0, bytes_accessed=int(bytes_accessed)),
    )(obs, w1, b1, w2, b2, w3, b3)

    return mean, value[:, 0]   # .squeeze(-1)


# --------------------------------------------------------------------------- #
# Pure-JAX reference (unfused, mirrors the PyTorch module).
# --------------------------------------------------------------------------- #
def reference_forward(obs, params):
    (w1p, b1p, w2p, b2p, w3p, b3p, w1v, b1v, w2v, b2v, w3v, b3v) = params

    def mlp(x, w1, b1, w2, b2, w3, b3):
        h = jnp.maximum(x @ w1 + b1, 0.0)
        h = jnp.maximum(h @ w2 + b2, 0.0)
        return h @ w3 + b3

    mean = mlp(obs, w1p, b1p, w2p, b2p, w3p, b3p)
    value = mlp(obs, w1v, b1v, w2v, b2v, w3v, b3v)[:, 0]
    return mean, value


if __name__ == "__main__":
    key = jax.random.PRNGKey(0)
    k_obs, k_params, k_mid, k_big = jax.random.split(key, 4)

    batch = 8
    obs_dim = 16
    hidden_size = 32

    params, log_std = init_params(k_params, obs_dim, hidden_size)
    fused = fuse_params(params)

    # --- small batch: single grid step, block == full array ---
    obs = jax.random.normal(k_obs, (batch, obs_dim), jnp.float32)
    mean, value = jax.block_until_ready(actor_critic_forward(obs, fused))
    mean_ref, value_ref = reference_forward(obs, params)
    assert mean.shape == (batch, 3) and value.shape == (batch,)
    assert jnp.allclose(mean, mean_ref, atol=1e-5, rtol=1e-5)
    assert jnp.allclose(value, value_ref, atol=1e-5, rtol=1e-5)

    # --- mid batch: forced 2-tile split (v7x megacore path) + masked ragged block ---
    b_mid = 1500
    obs_mid = jax.random.normal(k_mid, (b_mid, obs_dim), jnp.float32)
    mean_m, value_m = jax.block_until_ready(actor_critic_forward(obs_mid, fused))
    mean_m_ref, value_m_ref = reference_forward(obs_mid, params)
    assert mean_m.shape == (b_mid, 3) and value_m.shape == (b_mid,)
    assert jnp.allclose(mean_m, mean_m_ref, atol=1e-4, rtol=1e-4)
    assert jnp.allclose(value_m, value_m_ref, atol=1e-4, rtol=1e-4)

    # --- larger batch: multi-tile pipelined grid, no wrapper padding, ragged last block ---
    b_big = 1030  # deliberately not a multiple of the tile
    obs_big = jax.random.normal(k_big, (b_big, obs_dim), jnp.float32)
    mean_b, value_b = jax.block_until_ready(
        actor_critic_forward(obs_big, fused, block_rows=512))
    mean_b_ref, value_b_ref = reference_forward(obs_big, params)
    assert mean_b.shape == (b_big, 3) and value_b.shape == (b_big,)
    assert jnp.allclose(mean_b, mean_b_ref, atol=1e-4, rtol=1e-4)
    assert jnp.allclose(value_b, value_b_ref, atol=1e-4, rtol=1e-4)

    # std property (not part of forward): exp(log_std) == ones(3)
    _std = jnp.exp(log_std)

    print("KERNEL_OK")
</pallas_src>

<mosaic_0001>
module attributes {stable_mosaic.version = 11 : i64} {
  func.func @_fused_actor_critic_kernel(%arg0: i32, %arg1: memref<8x16xf32, #tpu.memory_space<vmem>>, %arg2: memref<16x64xf32, #tpu.memory_space<vmem>>, %arg3: memref<1x64xf32, #tpu.memory_space<vmem>>, %arg4: memref<64x64xf32, #tpu.memory_space<vmem>>, %arg5: memref<1x64xf32, #tpu.memory_space<vmem>>, %arg6: memref<64x4xf32, #tpu.memory_space<vmem>>, %arg7: memref<1x4xf32, #tpu.memory_space<vmem>>, %arg8: memref<8x3xf32, #tpu.memory_space<vmem>>, %arg9: memref<8x1xf32, #tpu.memory_space<vmem>>) attributes {dimension_semantics = [#tpu.dimension_semantics<parallel>], iteration_bounds = array<i64: 1>, scalar_prefetch = 0 : i64, scratch_operands = 0 : i64, tpu.core_type = #tpu.core_type<tc>, window_params = [{transform_indices = @transform_0, window_bounds = array<i64: 8, 16>}, {pipeline_mode = #tpu.pipeline_mode<synchronous>, transform_indices = @transform_1, window_bounds = array<i64: 16, 64>}, {pipeline_mode = #tpu.pipeline_mode<synchronous>, transform_indices = @transform_2, window_bounds = array<i64: 1, 64>}, {pipeline_mode = #tpu.pipeline_mode<synchronous>, transform_indices = @transform_3, window_bounds = array<i64: 64, 64>}, {pipeline_mode = #tpu.pipeline_mode<synchronous>, transform_indices = @transform_4, window_bounds = array<i64: 1, 64>}, {pipeline_mode = #tpu.pipeline_mode<synchronous>, transform_indices = @transform_5, window_bounds = array<i64: 64, 4>}, {pipeline_mode = #tpu.pipeline_mode<synchronous>, transform_indices = @transform_6, window_bounds = array<i64: 1, 4>}, {transform_indices = @transform_7, window_bounds = array<i64: 8, 3>}, {transform_indices = @transform_8, window_bounds = array<i64: 8, 1>}]} {
    %c0 = arith.constant 0 : index
    %c0_0 = arith.constant 0 : index
    %0 = vector.load %arg1[%c0, %c0_0] : memref<8x16xf32, #tpu.memory_space<vmem>>, vector<8x16xf32>
    %c0_1 = arith.constant 0 : index
    %c0_2 = arith.constant 0 : index
    %1 = vector.load %arg2[%c0_1, %c0_2] : memref<16x64xf32, #tpu.memory_space<vmem>>, vector<16x64xf32>
    %cst = arith.constant dense<0.000000e+00> : vector<8x64xf32>
    %2 = tpu.matmul %0, %1, %cst {dimension_numbers = #tpu.dot_dimension_numbers<[1], [0], [0], [1], [0, 0, 1, 1], [], []>} : vector<8x16xf32>, vector<16x64xf32>, vector<8x64xf32> -> vector<8x64xf32>
    %c0_3 = arith.constant 0 : index
    %c0_4 = arith.constant 0 : index
    %3 = vector.load %arg3[%c0_3, %c0_4] : memref<1x64xf32, #tpu.memory_space<vmem>>, vector<1x64xf32>
    %4 = vector.broadcast %3 : vector<1x64xf32> to vector<8x64xf32>
    %5 = arith.addf %2, %4 : vector<8x64xf32>
    %cst_5 = arith.constant 0.000000e+00 : f32
    %6 = vector.broadcast %cst_5 : f32 to vector<8x64xf32>
    %7 = arith.maximumf %5, %6 : vector<8x64xf32>
    %c0_6 = arith.constant 0 : index
    %c0_7 = arith.constant 0 : index
    %8 = vector.load %arg4[%c0_6, %c0_7] : memref<64x64xf32, #tpu.memory_space<vmem>>, vector<64x64xf32>
    %cst_8 = arith.constant dense<0.000000e+00> : vector<8x64xf32>
    %9 = tpu.matmul %7, %8, %cst_8 {dimension_numbers = #tpu.dot_dimension_numbers<[1], [0], [0], [1], [0, 0, 1, 1], [], []>} : vector<8x64xf32>, vector<64x64xf32>, vector<8x64xf32> -> vector<8x64xf32>
    %c0_9 = arith.constant 0 : index
    %c0_10 = arith.constant 0 : index
    %10 = vector.load %arg5[%c0_9, %c0_10] : memref<1x64xf32, #tpu.memory_space<vmem>>, vector<1x64xf32>
    %11 = vector.broadcast %10 : vector<1x64xf32> to vector<8x64xf32>
    %12 = arith.addf %9, %11 : vector<8x64xf32>
    %cst_11 = arith.constant 0.000000e+00 : f32
    %13 = vector.broadcast %cst_11 : f32 to vector<8x64xf32>
    %14 = arith.maximumf %12, %13 : vector<8x64xf32>
    %c0_12 = arith.constant 0 : index
    %c0_13 = arith.constant 0 : index
    %15 = vector.load %arg6[%c0_12, %c0_13] : memref<64x4xf32, #tpu.memory_space<vmem>>, vector<64x4xf32>
    %cst_14 = arith.constant dense<0.000000e+00> : vector<8x4xf32>
    %16 = tpu.matmul %14, %15, %cst_14 {dimension_numbers = #tpu.dot_dimension_numbers<[1], [0], [0], [1], [0, 0, 1, 1], [], []>} : vector<8x64xf32>, vector<64x4xf32>, vector<8x4xf32> -> vector<8x4xf32>
    %c0_15 = arith.constant 0 : index
    %c0_16 = arith.constant 0 : index
    %17 = vector.load %arg7[%c0_15, %c0_16] : memref<1x4xf32, #tpu.memory_space<vmem>>, vector<1x4xf32>
    %18 = vector.broadcast %17 : vector<1x4xf32> to vector<8x4xf32>
    %19 = arith.addf %16, %18 : vector<8x4xf32>
    %20 = vector.extract_strided_slice %19 {offsets = [0, 0], sizes = [8, 3], strides = [1, 1]} : vector<8x4xf32> to vector<8x3xf32>
    %c0_17 = arith.constant 0 : index
    %c0_18 = arith.constant 0 : index
    %21 = vector.load %arg8[%c0_17, %c0_18] : memref<8x3xf32, #tpu.memory_space<vmem>>, vector<8x3xf32>
    tpu.vector_store %arg8[%c0_17, %c0_18], %20 {strides = array<i32>} : memref<8x3xf32, #tpu.memory_space<vmem>>, vector<8x3xf32>,
    %22 = vector.extract_strided_slice %19 {offsets = [0, 3], sizes = [8, 1], strides = [1, 1]} : vector<8x4xf32> to vector<8x1xf32>
    %c0_19 = arith.constant 0 : index
    %c0_20 = arith.constant 0 : index
    %23 = vector.load %arg9[%c0_19, %c0_20] : memref<8x1xf32, #tpu.memory_space<vmem>>, vector<8x1xf32>
    tpu.vector_store %arg9[%c0_19, %c0_20], %22 {strides = array<i32>} : memref<8x1xf32, #tpu.memory_space<vmem>>, vector<8x1xf32>,
    return
  }
  func.func @transform_0(%arg0: i32) -> (i32, i32) {
    %c0_i32 = arith.constant 0 : i32
    %c0_i32_0 = arith.constant 0 : i32
    return %arg0, %c0_i32 : i32, i32
  }
  func.func @transform_1(%arg0: i32) -> (i32, i32) {
    %c0_i32 = arith.constant 0 : i32
    %c0_i32_0 = arith.constant 0 : i32
    %c0_i32_1 = arith.constant 0 : i32
    return %c0_i32, %c0_i32_0 : i32, i32
  }
  func.func @transform_2(%arg0: i32) -> (i32, i32) {
    %c0_i32 = arith.constant 0 : i32
    %c0_i32_0 = arith.constant 0 : i32
    %c0_i32_1 = arith.constant 0 : i32
    return %c0_i32, %c0_i32_0 : i32, i32
  }
  func.func @transform_3(%arg0: i32) -> (i32, i32) {
    %c0_i32 = arith.constant 0 : i32
    %c0_i32_0 = arith.constant 0 : i32
    %c0_i32_1 = arith.constant 0 : i32
    return %c0_i32, %c0_i32_0 : i32, i32
  }
  func.func @transform_4(%arg0: i32) -> (i32, i32) {
    %c0_i32 = arith.constant 0 : i32
    %c0_i32_0 = arith.constant 0 : i32
    %c0_i32_1 = arith.constant 0 : i32
    return %c0_i32, %c0_i32_0 : i32, i32
  }
  func.func @transform_5(%arg0: i32) -> (i32, i32) {
    %c0_i32 = arith.constant 0 : i32
    %c0_i32_0 = arith.constant 0 : i32
    %c0_i32_1 = arith.constant 0 : i32
    return %c0_i32, %c0_i32_0 : i32, i32
  }
  func.func @transform_6(%arg0: i32) -> (i32, i32) {
    %c0_i32 = arith.constant 0 : i32
    %c0_i32_0 = arith.constant 0 : i32
    %c0_i32_1 = arith.constant 0 : i32
    return %c0_i32, %c0_i32_0 : i32, i32
  }
  func.func @transform_7(%arg0: i32) -> (i32, i32) {
    %c0_i32 = arith.constant 0 : i32
    %c0_i32_0 = arith.constant 0 : i32
    return %arg0, %c0_i32 : i32, i32
  }
  func.func @transform_8(%arg0: i32) -> (i32, i32) {
    %c0_i32 = arith.constant 0 : i32
    %c0_i32_0 = arith.constant 0 : i32
    return %arg0, %c0_i32 : i32, i32
  }
}

</mosaic_0001>

<bundles_post_ra>
// kernel: actor_critic_forward.1
= control target key start
LH: loop header
LB: loop body
LE: loop exit
PB: predicated region body
PF: predicated region fallthrough
CT: control target
= control target key end

     0   :  { %14 = vsyncpa [#allocation3], 0  ;;  %s605_s0 = inlined_call_operand.vmem [shape: f32[8,16], index: 0, kind: input, shape index: {}]   ;;  %s606_s1 = inlined_call_operand.hbm [shape: f32[16,64], index: 1, kind: input, shape index: {}]   ;;  %s607_s2 = inlined_call_operand.vmem [shape: f32[1,64], index: 2, kind: input, shape index: {}]   ;;  %s608_s3 = inlined_call_operand.vmem [shape: f32[64,64], index: 3, kind: input, shape index: {}]   ;;  %s609_s4 = inlined_call_operand.hbm [shape: f32[1,64], index: 4, kind: input, shape index: {}]   ;;  %s610_s5 = inlined_call_operand.vmem [shape: f32[64,4], index: 5, kind: input, shape index: {}]   ;;  %s611_s6 = inlined_call_operand.vmem [shape: f32[1,4], index: 6, kind: input, shape index: {}]   ;;  %s612_s7 = inlined_call_operand.vmem [shape: f32[8,3], index: 7, kind: output, shape index: {0}]   ;;  %s613_s8 = inlined_call_operand.vmem [shape: f32[8,1], index: 8, kind: output, shape index: {1}]  }
   0x1   :  { %15 = vsyncpa [#allocation5], 0  ;;  %s458_s27 = smov [#allocation2]  }
   0x2   :  { %s23_s28 = sshll.u32 %s458_s27, 4  ;;  %s24_s28 = int_to_ptr.vmem [resolvable:$true] %s23_s28 }
   0x3   :  { %s422_s29 = scalar_lea.vmem %s24_s28, 256  ;;  %p427_p1 = scmp.lt.s32.totalorder %s24_s28, %s24_s28 }
   0x4   :  { %p423_p0 = scmp.ne.s32.totalorder %s24_s28, %s422_s29  ;;  %p428_p2 = scmp.lt.s32.totalorder %s422_s29, %s422_s29 }
   0x6   :  { %p429_p3 = por %p428_p2, %p427_p1 }
   0x8   :  { %p430_p4 = pnand %p429_p3, %p423_p0 }
   0xa   :  { %433 = shalt.err (!%p430_p4)
}
   0xb   :  { %s459_s30 = smov 128   ;;  %s460_s9 = smov 8  }
   0xc   :  { %29 = dma.hbm_to_vmem [thread:$0]  %s606_s1, 256, %s24_s28, [#allocation3], %s459_s30, %s459_s30, %s460_s9  }
   0xd   :  { %s461_s12 = smov [#allocation4]  }
   0xe   :  { %s40_s13 = sshll.u32 %s461_s12, 4  ;;  %s41_s13 = int_to_ptr.vmem [resolvable:$true] %s40_s13 }
   0xf   :  { %s442_s14 = scalar_lea.vmem %s41_s13, 16  ;;  %s446_s15 = scalar_lea.vmem %s41_s13, 32 }
  0x10   :  { %p443_p5 = scmp.ne.s32.totalorder %s41_s13, %s442_s14  ;;  %p447_p6 = scmp.lt.s32.totalorder %s41_s13, %s41_s13 }
  0x11   :  { %p448_p7 = scmp.lt.s32.totalorder %s446_s15, %s442_s14 }
  0x13   :  { %p449_p8 = por %p448_p7, %p447_p6 }
  0x15   :  { %p450_p9 = pnand %p449_p8, %p443_p5 }
  0x17   :  { %453 = shalt.err (!%p450_p9)
}
  0x18   :  { %43 = dma.hbm_to_vmem [thread:$0]  %s609_s4, 16, %s41_s13, [#allocation5]  }
  0x19   :  { %454 = dma.done.wait [#allocation3], 256  }
  0x1a   :  { %455 = vsyncadd [#allocation3], 4294967040 }
  0x1b   :  { %456 = dma.done.wait [#allocation5], 16  }
  0x1c   :  { %457 = vsyncadd [#allocation5], 4294967280  ;;  %v462_v0 = vmov 0.0   ;;  %vm463_vm0 = vmmov 0   ;;  %v56_v1 = vld [vmem:[#allocation2 + $0x8] sm:$0xff]  ;;  %v55_v2 = vld [vmem:[#allocation2] sm:$0xff] }
  0x1d   :  { %362 = vmatprep.subr.mxu0 %v462_v0  ;;  %366 = vmatprep.mubr.msk.f32.mxu0 %vm463_vm0, %v462_v0  ;;  %v54_v3 = vld [vmem:[%s605_s0] sm:$0xff]  ;;  %vm64_vm1 = vcmask 130048   ;;  %v146_v4 = vld [vmem:[%s608_s3 + $0x38] sm:$0xff]  ;;  %v145_v5 = vld [vmem:[%s608_s3 + $0x30] sm:$0xff]  ;;  %vm154_vm2 = vcmask 523264   ;;  %vm317_vm3 = vcmask 23552  }
  0x1e   :  { %369 = vmatprep.subr.mxu1 %v462_v0  ;;  %385 = vmatprep.mubr.msk.f32.mxu1 %vm463_vm0, %v462_v0  ;;  %v144_v6 = vld [vmem:[%s608_s3 + $0x28] sm:$0xff]  ;;  %v143_v7 = vld [vmem:[%s608_s3 + $0x20] sm:$0xff]  ;;  %v142_v8 = vld [vmem:[%s608_s3 + $0x18] sm:$0xff]  ;;  %vm323_vm4 = vcmask 7168  }
  0x1f   :  { %363 = vmatpush3.msra.mxu0 %v56_v1  ;;  %370 = vmatpush3.msra.mxu1 %v146_v4  ;;  %v141_v9 = vld [vmem:[%s608_s3 + $0x10] sm:$0xff]  ;;  %v140_v10 = vld [vmem:[%s608_s3 + $0x8] sm:$0xff]  ;;  %v139_v11 = vld [vmem:[%s608_s3] sm:$0xff] }
  0x20   :  { %364 = vmatprep.subr.mxu0 %v462_v0  ;;  %371 = vmatprep.subr.mxu1 %v462_v0  ;;  %v236_v12 = vld [vmem:[%s610_s5 + $0x38] sm:$0xff]  ;;  %v235_v13 = vld [vmem:[%s610_s5 + $0x30] sm:$0xff]  ;;  %v234_v14 = vld [vmem:[%s610_s5 + $0x28] sm:$0xff] }
  0x21   :  { %365 = vmatpush3.msra.mxu0 %v55_v2  ;;  %372 = vmatpush3.msra.mxu1 %v145_v5  ;;  %v233_v15 = vld [vmem:[%s610_s5 + $0x20] sm:$0xff]  ;;  %v232_v16 = vld [vmem:[%s610_s5 + $0x18] sm:$0xff]  ;;  %v231_v22 = vld [vmem:[%s610_s5 + $0x10] sm:$0xff] }
  0x22   :  { %367 = vmatmul.mubr.msk.f32.vlgmr.msra.gmra.mxu0 %vm64_vm1, %v54_v3  ;;  %373 = vmatprep.subr.mxu1 %v462_v0  ;;  %v335_v17 = vld [vmem:[%s607_s2] ss:$0 sm:$0xff]  ;;  %v230_v23 = vld [vmem:[%s610_s5 + $0x8] sm:$0xff]  ;;  %v337_v25 = vld [vmem:[#allocation4] ss:$0 sm:$0xff] }
  0x23   :  { %388 = vmatprep.subr.mxu0 %v462_v0  ;;  %374 = vmatpush3.msra.mxu1 %v144_v6  ;;  %v229_v24 = vld [vmem:[%s610_s5] sm:$0xff]  ;;  %s464_s5 = smov 125  }
  0x24   :  { %404 = vmatprep.mubr.msk.f32.mxu0 %vm463_vm0, %v462_v0  ;;  %375 = vmatprep.subr.mxu1 %v462_v0  ;;  %v339_v30 = vld [vmem:[%s611_s6] ss:$0 sm:$0xff] }
  0x25   :  { %376 = vmatpush3.msra.mxu1 %v143_v7  ;;  %389 = vmatpush3.msra.mxu0 %v236_v12 }
  0x26   :  { %377 = vmatprep.subr.mxu1 %v462_v0  ;;  %390 = vmatprep.subr.mxu0 %v462_v0 }
  0x27   :  { %378 = vmatpush3.msra.mxu1 %v142_v8  ;;  %391 = vmatpush3.msra.mxu0 %v235_v13 }
  0x28   :  { %379 = vmatprep.subr.mxu1 %v462_v0  ;;  %392 = vmatprep.subr.mxu0 %v462_v0 }
  0x29   :  { %380 = vmatpush3.msra.mxu1 %v141_v9  ;;  %393 = vmatpush3.msra.mxu0 %v234_v14 }
  0x2a   :  { %381 = vmatprep.subr.mxu1 %v462_v0  ;;  %394 = vmatprep.subr.mxu0 %v462_v0 }
  0x2b   :  { %382 = vmatpush3.msra.mxu1 %v140_v10  ;;  %395 = vmatpush3.msra.mxu0 %v233_v15 }
  0x2c   :  { %383 = vmatprep.subr.mxu1 %v462_v0  ;;  %396 = vmatprep.subr.mxu0 %v462_v0 }
  0x2d   :  { %384 = vmatpush3.msra.mxu1 %v139_v11  ;;  %397 = vmatpush3.msra.mxu0 %v232_v16 }
  0x2e   :  { %398 = vmatprep.subr.mxu0 %v462_v0 }
  0x2f   :  { %399 = vmatpush3.msra.mxu0 %v231_v22 }
  0x30   :  { %400 = vmatprep.subr.mxu0 %v462_v0 }
  0x31   :  { %401 = vmatpush3.msra.mxu0 %v230_v23 }
  0x32   :  { %402 = vmatprep.subr.mxu0 %v462_v0 }
  0x33   :  { %403 = vmatpush3.msra.mxu0 %v229_v24 }
  0xe2   :  { %v134_v18 = vpop.f32.mrf.mxu0 }
  0xe3   :  { %v135_v19 = vadd.f32 %v335_v17, %v134_v18 }
  0xe4   :  { %v368_v20 = vpop.f32.mrf.mxu0 }
  0xe5   :  { %v138_v21 = vmax.f32 %v135_v19, 0.0 }
  0xe7   :  { %386 = vmatmul.mubr.msk.f32.vlgmr.msra.gmra.mxu1 %vm154_vm2, %v138_v21 }
 0x1a7   :  { %v224_v26 = vpop.f32.mrf.mxu1 }
 0x1a8   :  { %v225_v27 = vadd.f32 %v337_v25, %v224_v26 }
 0x1a9   :  { %v387_v28 = vpop.f32.mrf.mxu1 }
 0x1aa   :  { %v228_v29 = vmax.f32 %v225_v27, 0.0 }
 0x1ac   :  { %405 = vmatmul.mubr.msk.f32.vlgmr.msra.gmra.mxu0 %vm154_vm2, %v228_v29 }
 0x26c   :  { %v313_v31 = vpop.f32.mrf.mxu0 }
 0x26d   :  { %v314_v32 = vadd.f32 %v339_v30, %v313_v31 }
 0x26e   :  { %v406_v33 = vpop.f32.mrf.mxu0 }
 0x26f   :  { %318 = vst.msk [vmem:[%s612_s7] sm:$0xff] %vm317_vm3, %v314_v32  ;;  %320 = vrot.lane.b32.xlu0 %v314_v32, %s464_s5 }
 0x2e1   :  { %v321_v34 = vpop.permute.xlu0 %320 }
 0x2e2   :  { %324 = vst.msk [vmem:[%s613_s8] sm:$0xff] %vm323_vm4, %v321_v34 }
 0x2e3   :  { %333 = vsyncpa [#allocation3], 1 }
 0x2e4   :  { %334 = vsyncpa [#allocation5], 1 }

</bundles_post_ra>
